<compile_context>
chip_gen: v7x
topology: tpu7x:2x2x1
jax: 0.10.0
libtpu: 0.0.40
codegen_flags: <defaults>
</compile_context>

<pallas_src>
import functools

import jax
import jax.numpy as jnp
from jax import lax
from jax.experimental import pallas as pl
from jax.experimental.pallas import tpu as pltpu


def _cdan_kernel(g_ref, f_ref, w1t_ref, b1_ref, w2_ref, b2_ref, w3_ref, b3_ref,
                 out_ref,
                 *, n_src, n_tgt, num_classes, hidden, entropy_conditioning):
    n = n_src + n_tgt
    n_pad = g_ref.shape[0]

    g = g_ref[...].astype(jnp.float32)    # (Np, C)
    f = f_ref[...].astype(jnp.float32)    # (Np, F)

    # softmax over classes (detach only affects grads; forward is identical)
    g_max = jnp.max(g, axis=1, keepdims=True)
    e = jnp.exp(g - g_max)
    g_sm = e / jnp.sum(e, axis=1, keepdims=True)                                # (Np, C)

    # Reassociated first layer: never materialize h = (g ⊗ f).view(N, C*F).
    # T = f @ W1_t  with W1_t (F, C*H), then z1 = sum_c g_sm[:, c] * T[:, c*H:(c+1)*H].
    t = jnp.dot(f, w1t_ref[...], preferred_element_type=jnp.float32)            # (Np, C*H)
    z1 = g_sm[:, 0:1] * t[:, 0:hidden]
    for c in range(1, num_classes):
        z1 = z1 + g_sm[:, c:c + 1] * t[:, c * hidden:(c + 1) * hidden]
    z1 = jnp.maximum(z1 + b1_ref[...], 0.0)                                     # (Np, H)

    z2 = jnp.dot(z1, w2_ref[...], preferred_element_type=jnp.float32) + b2_ref[...]
    z2 = jnp.maximum(z2, 0.0)                                                   # (Np, H)

    # Final (H -> 1) layer as VPU multiply + lane reduce (w3 passed as a (1, H) row).
    logits = jnp.sum(z2 * w3_ref[...], axis=1, keepdims=True) + b3_ref[...]     # (Np, 1)

    # Row-validity mask (padded rows contribute nothing) and domain labels:
    # first n_src samples = 1 (source), next n_tgt = 0 (target).
    idx = lax.broadcasted_iota(jnp.int32, (n_pad, 1), 0)
    valid = (idx < n).astype(jnp.float32)
    y = (idx < n_src).astype(jnp.float32)

    # binary_accuracy: sigmoid(z) >= 0.5  <=>  z >= 0
    pred = (logits >= 0.0).astype(jnp.float32)
    correct = jnp.sum((pred == y).astype(jnp.float32) * valid)
    acc = correct * (100.0 / n)

    # BCE from logits: y*softplus(-z) + (1-y)*softplus(z) = softplus(z) - y*z
    # (stable softplus; 1 exp + 1 log per row, no sigmoid, no -inf -> clamp path).
    sp = jnp.maximum(logits, 0.0) + jnp.log(1.0 + jnp.exp(-jnp.abs(logits)))
    per_ex = sp - y * logits                                                    # (Np, 1)

    if entropy_conditioning:
        eps = 1e-5
        ent = -jnp.sum(g_sm * jnp.log(g_sm + eps), axis=1, keepdims=True)       # (Np, 1)
        w = (1.0 + jnp.exp(-ent)) * valid
        w = w / jnp.sum(w) * n
        per_ex = per_ex * w

    loss = jnp.sum(per_ex * valid) / n

    out_ref[0] = loss
    out_ref[1] = acc


def cdan_loss(g_s, f_s, g_t, f_t, params, *, entropy_conditioning=False):
    """Returns (loss, domain_discriminator_accuracy)."""
    n_src, num_classes = g_s.shape
    n_tgt = g_t.shape[0]
    feat_dim = f_s.shape[1]
    w1, b1, w2, b2, w3, b3 = params
    hidden = w2.shape[0]

    n = n_src + n_tgt
    n_pad = max(8, ((n + 7) // 8) * 8)

    # Concats (and sublane padding) happen in the wrapper, not in the kernel.
    g = jnp.concatenate([g_s, g_t], axis=0)
    f = jnp.concatenate([f_s, f_t], axis=0)
    if n_pad > n:
        g = jnp.pad(g, ((0, n_pad - n), (0, 0)))
        f = jnp.pad(f, ((0, n_pad - n), (0, 0)))

    # Reassociate the first layer: W1[c*F + fi, h] -> W1_t[fi, c*H + h].
    w1_t = jnp.transpose(w1.reshape(num_classes, feat_dim, hidden),
                         (1, 0, 2)).reshape(feat_dim, num_classes * hidden)
    w3_row = w3.reshape(1, hidden)

    kernel = functools.partial(
        _cdan_kernel,
        n_src=n_src, n_tgt=n_tgt, num_classes=num_classes, hidden=hidden,
        entropy_conditioning=entropy_conditioning)

    flops = 2 * n_pad * (feat_dim * num_classes * hidden + hidden * hidden + hidden)
    transcendentals = n_pad * (num_classes + 3)
    bytes_accessed = 4 * (g.size + f.size + w1_t.size + b1.size + w2.size
                          + b2.size + w3_row.size + b3.size) + 8

    vmem = pl.BlockSpec(memory_space=pltpu.MemorySpace.VMEM)
    smem = pl.BlockSpec(memory_space=pltpu.MemorySpace.SMEM)
    out = pl.pallas_call(
        kernel,
        out_shape=jax.ShapeDtypeStruct((2,), jnp.float32),
        in_specs=[vmem] * 8,
        out_specs=smem,
        cost_estimate=pl.CostEstimate(flops=int(flops),
                                      transcendentals=int(transcendentals),
                                      bytes_accessed=int(bytes_accessed)),
    )(g, f, w1_t, b1, w2, b2, w3_row, b3)
    return out[0], out[1]


def _reference(g_s, f_s, g_t, f_t, params, *, entropy_conditioning=False):
    """Pure-JAX reference mirroring the torch forward. Returns (loss, accuracy)."""
    w1, b1, w2, b2, w3, b3 = params
    f = jnp.concatenate([f_s, f_t], axis=0).astype(jnp.float32)
    g = jax.nn.softmax(jnp.concatenate([g_s, g_t], axis=0).astype(jnp.float32), axis=1)
    n = f.shape[0]
    h = (g[:, :, None] * f[:, None, :]).reshape(n, -1)
    z1 = jnp.maximum(h @ w1 + b1, 0.0)
    z2 = jnp.maximum(z1 @ w2 + b2, 0.0)
    d = jax.nn.sigmoid(z2 @ w3 + b3)
    y = jnp.concatenate([jnp.ones((g_s.shape[0], 1)), jnp.zeros((g_t.shape[0], 1))], axis=0)
    per_ex = -(y * jnp.maximum(jnp.log(d), -100.0)
               + (1.0 - y) * jnp.maximum(jnp.log(1.0 - d), -100.0))
    if entropy_conditioning:
        ent = -jnp.sum(g * jnp.log(g + 1e-5), axis=1, keepdims=True)
        w = 1.0 + jnp.exp(-ent)
        w = w / jnp.sum(w) * n
        per_ex = per_ex * w
    acc = jnp.sum(((d >= 0.5).astype(jnp.float32) == y).astype(jnp.float32)) * (100.0 / n)
    return jnp.mean(per_ex), acc


if __name__ == "__main__":
    B = 2        # per-domain minibatch
    C = 4        # num classes
    F_DIM = 32   # feature dim
    H = 128      # discriminator hidden size
    IN_DIM = C * F_DIM

    key = jax.random.PRNGKey(0)
    k = jax.random.split(key, 10)
    g_s = jax.random.normal(k[0], (B, C), jnp.float32)
    f_s = jax.random.normal(k[1], (B, F_DIM), jnp.float32)
    g_t = jax.random.normal(k[2], (B, C), jnp.float32)
    f_t = jax.random.normal(k[3], (B, F_DIM), jnp.float32)

    params = (
        jax.random.normal(k[4], (IN_DIM, H), jnp.float32) * 0.05,
        jnp.zeros((1, H), jnp.float32),
        jax.random.normal(k[5], (H, H), jnp.float32) * 0.05,
        jnp.zeros((1, H), jnp.float32),
        jax.random.normal(k[6], (H, 1), jnp.float32) * 0.05,
        jnp.zeros((1, 1), jnp.float32),
    )

    # default (no entropy conditioning)
    loss, acc = cdan_loss(g_s, f_s, g_t, f_t, params, entropy_conditioning=False)
    loss = jax.block_until_ready(loss)
    acc = jax.block_until_ready(acc)
    ref_loss, ref_acc = _reference(g_s, f_s, g_t, f_t, params, entropy_conditioning=False)
    ref_loss = jax.block_until_ready(ref_loss)
    ref_acc = jax.block_until_ready(ref_acc)
    assert abs(float(loss) - float(ref_loss)) < 2e-3, (float(loss), float(ref_loss))
    assert abs(float(acc) - float(ref_acc)) < 1e-3, (float(acc), float(ref_acc))

    # entropy-conditioned variant
    loss_e, acc_e = cdan_loss(g_s, f_s, g_t, f_t, params, entropy_conditioning=True)
    loss_e = jax.block_until_ready(loss_e)
    acc_e = jax.block_until_ready(acc_e)
    ref_loss_e, _ = _reference(g_s, f_s, g_t, f_t, params, entropy_conditioning=True)
    ref_loss_e = jax.block_until_ready(ref_loss_e)
    assert abs(float(loss_e) - float(ref_loss_e)) < 2e-3, (float(loss_e), float(ref_loss_e))

    print("KERNEL_OK")
</pallas_src>

<mosaic_0001>
module attributes {stable_mosaic.version = 11 : i64} {
  func.func @_cdan_kernel(%arg0: memref<8x4xf32, #tpu.memory_space<vmem>>, %arg1: memref<8x32xf32, #tpu.memory_space<vmem>>, %arg2: memref<32x512xf32, #tpu.memory_space<vmem>>, %arg3: memref<1x128xf32, #tpu.memory_space<vmem>>, %arg4: memref<128x128xf32, #tpu.memory_space<vmem>>, %arg5: memref<1x128xf32, #tpu.memory_space<vmem>>, %arg6: memref<1x128xf32, #tpu.memory_space<vmem>>, %arg7: memref<1x1xf32, #tpu.memory_space<vmem>>, %arg8: memref<2xf32, #tpu.memory_space<smem>>) attributes {dimension_semantics = [], scalar_prefetch = 0 : i64, scratch_operands = 0 : i64, tpu.core_type = #tpu.core_type<tc>} {
    %c0 = arith.constant 0 : index
    %c0_0 = arith.constant 0 : index
    %0 = vector.load %arg0[%c0, %c0_0] : memref<8x4xf32, #tpu.memory_space<vmem>>, vector<8x4xf32>
    %c0_1 = arith.constant 0 : index
    %c0_2 = arith.constant 0 : index
    %1 = vector.load %arg1[%c0_1, %c0_2] : memref<8x32xf32, #tpu.memory_space<vmem>>, vector<8x32xf32>
    %cst = arith.constant dense<0xFF800000> : vector<8xf32>
    %2 = vector.multi_reduction <maximumf>, %0, %cst [1] : vector<8x4xf32> to vector<8xf32>
    %3 = vector.shape_cast %2 : vector<8xf32> to vector<8x1xf32>
    %4 = vector.broadcast %3 : vector<8x1xf32> to vector<8x4xf32>
    %5 = arith.subf %0, %4 : vector<8x4xf32>
    %6 = math.exp %5 : vector<8x4xf32>
    %cst_3 = arith.constant dense<0.000000e+00> : vector<8xf32>
    %7 = vector.multi_reduction <add>, %6, %cst_3 [1] : vector<8x4xf32> to vector<8xf32>
    %8 = vector.shape_cast %7 : vector<8xf32> to vector<8x1xf32>
    %9 = vector.broadcast %8 : vector<8x1xf32> to vector<8x4xf32>
    %10 = arith.divf %6, %9 : vector<8x4xf32>
    %c0_4 = arith.constant 0 : index
    %c0_5 = arith.constant 0 : index
    %11 = vector.load %arg2[%c0_4, %c0_5] : memref<32x512xf32, #tpu.memory_space<vmem>>, vector<32x512xf32>
    %cst_6 = arith.constant dense<0.000000e+00> : vector<8x512xf32>
    %12 = tpu.matmul %1, %11, %cst_6 {dimension_numbers = #tpu.dot_dimension_numbers<[1], [0], [0], [1], [0, 0, 1, 1], [], []>} : vector<8x32xf32>, vector<32x512xf32>, vector<8x512xf32> -> vector<8x512xf32>
    %13 = vector.extract_strided_slice %10 {offsets = [0, 0], sizes = [8, 1], strides = [1, 1]} : vector<8x4xf32> to vector<8x1xf32>
    %14 = vector.extract_strided_slice %12 {offsets = [0, 0], sizes = [8, 128], strides = [1, 1]} : vector<8x512xf32> to vector<8x128xf32>
    %15 = vector.broadcast %13 : vector<8x1xf32> to vector<8x128xf32>
    %16 = arith.mulf %15, %14 : vector<8x128xf32>
    %17 = vector.extract_strided_slice %10 {offsets = [0, 1], sizes = [8, 1], strides = [1, 1]} : vector<8x4xf32> to vector<8x1xf32>
    %18 = vector.extract_strided_slice %12 {offsets = [0, 128], sizes = [8, 128], strides = [1, 1]} : vector<8x512xf32> to vector<8x128xf32>
    %19 = vector.broadcast %17 : vector<8x1xf32> to vector<8x128xf32>
    %20 = arith.mulf %19, %18 : vector<8x128xf32>
    %21 = arith.addf %16, %20 : vector<8x128xf32>
    %22 = vector.extract_strided_slice %10 {offsets = [0, 2], sizes = [8, 1], strides = [1, 1]} : vector<8x4xf32> to vector<8x1xf32>
    %23 = vector.extract_strided_slice %12 {offsets = [0, 256], sizes = [8, 128], strides = [1, 1]} : vector<8x512xf32> to vector<8x128xf32>
    %24 = vector.broadcast %22 : vector<8x1xf32> to vector<8x128xf32>
    %25 = arith.mulf %24, %23 : vector<8x128xf32>
    %26 = arith.addf %21, %25 : vector<8x128xf32>
    %27 = vector.extract_strided_slice %10 {offsets = [0, 3], sizes = [8, 1], strides = [1, 1]} : vector<8x4xf32> to vector<8x1xf32>
    %28 = vector.extract_strided_slice %12 {offsets = [0, 384], sizes = [8, 128], strides = [1, 1]} : vector<8x512xf32> to vector<8x128xf32>
    %29 = vector.broadcast %27 : vector<8x1xf32> to vector<8x128xf32>
    %30 = arith.mulf %29, %28 : vector<8x128xf32>
    %31 = arith.addf %26, %30 : vector<8x128xf32>
    %c0_7 = arith.constant 0 : index
    %c0_8 = arith.constant 0 : index
    %32 = vector.load %arg3[%c0_7, %c0_8] : memref<1x128xf32, #tpu.memory_space<vmem>>, vector<1x128xf32>
    %33 = vector.broadcast %32 : vector<1x128xf32> to vector<8x128xf32>
    %34 = arith.addf %31, %33 : vector<8x128xf32>
    %cst_9 = arith.constant 0.000000e+00 : f32
    %35 = vector.broadcast %cst_9 : f32 to vector<8x128xf32>
    %36 = arith.maximumf %34, %35 : vector<8x128xf32>
    %c0_10 = arith.constant 0 : index
    %c0_11 = arith.constant 0 : index
    %37 = vector.load %arg4[%c0_10, %c0_11] : memref<128x128xf32, #tpu.memory_space<vmem>>, vector<128x128xf32>
    %cst_12 = arith.constant dense<0.000000e+00> : vector<8x128xf32>
    %38 = tpu.matmul %36, %37, %cst_12 {dimension_numbers = #tpu.dot_dimension_numbers<[1], [0], [0], [1], [0, 0, 1, 1], [], []>} : vector<8x128xf32>, vector<128x128xf32>, vector<8x128xf32> -> vector<8x128xf32>
    %c0_13 = arith.constant 0 : index
    %c0_14 = arith.constant 0 : index
    %39 = vector.load %arg5[%c0_13, %c0_14] : memref<1x128xf32, #tpu.memory_space<vmem>>, vector<1x128xf32>
    %40 = vector.broadcast %39 : vector<1x128xf32> to vector<8x128xf32>
    %41 = arith.addf %38, %40 : vector<8x128xf32>
    %cst_15 = arith.constant 0.000000e+00 : f32
    %42 = vector.broadcast %cst_15 : f32 to vector<8x128xf32>
    %43 = arith.maximumf %41, %42 : vector<8x128xf32>
    %c0_16 = arith.constant 0 : index
    %c0_17 = arith.constant 0 : index
    %44 = vector.load %arg6[%c0_16, %c0_17] : memref<1x128xf32, #tpu.memory_space<vmem>>, vector<1x128xf32>
    %45 = vector.broadcast %44 : vector<1x128xf32> to vector<8x128xf32>
    %46 = arith.mulf %43, %45 : vector<8x128xf32>
    %cst_18 = arith.constant dense<0.000000e+00> : vector<8xf32>
    %47 = vector.multi_reduction <add>, %46, %cst_18 [1] : vector<8x128xf32> to vector<8xf32>
    %48 = vector.shape_cast %47 : vector<8xf32> to vector<8x1xf32>
    %c0_19 = arith.constant 0 : index
    %c0_20 = arith.constant 0 : index
    %49 = vector.load %arg7[%c0_19, %c0_20] : memref<1x1xf32, #tpu.memory_space<vmem>>, vector<1x1xf32>
    %50 = vector.broadcast %49 : vector<1x1xf32> to vector<8x1xf32>
    %51 = arith.addf %48, %50 : vector<8x1xf32>
    %52 = tpu.iota {dimensions = array<i32: 0>} : vector<8x1xi32>
    %c4_i32 = arith.constant 4 : i32
    %53 = vector.broadcast %c4_i32 : i32 to vector<8x1xi32>
    %54 = arith.cmpi slt, %52, %53 : vector<8x1xi32>
    %55 = arith.extui %54 : vector<8x1xi1> to vector<8x1xi32>
    %56 = arith.sitofp %55 : vector<8x1xi32> to vector<8x1xf32>
    %c2_i32 = arith.constant 2 : i32
    %57 = vector.broadcast %c2_i32 : i32 to vector<8x1xi32>
    %58 = arith.cmpi slt, %52, %57 : vector<8x1xi32>
    %59 = arith.extui %58 : vector<8x1xi1> to vector<8x1xi32>
    %60 = arith.sitofp %59 : vector<8x1xi32> to vector<8x1xf32>
    %cst_21 = arith.constant 0.000000e+00 : f32
    %61 = vector.broadcast %cst_21 : f32 to vector<8x1xf32>
    %62 = arith.cmpf oge, %51, %61 : vector<8x1xf32>
    %63 = arith.extui %62 : vector<8x1xi1> to vector<8x1xi32>
    %64 = arith.sitofp %63 : vector<8x1xi32> to vector<8x1xf32>
    %65 = arith.cmpf oeq, %64, %60 : vector<8x1xf32>
    %66 = arith.extui %65 : vector<8x1xi1> to vector<8x1xi32>
    %67 = arith.sitofp %66 : vector<8x1xi32> to vector<8x1xf32>
    %68 = arith.mulf %67, %56 : vector<8x1xf32>
    %69 = vector.shape_cast %68 : vector<8x1xf32> to vector<1x8x1xf32>
    %cst_22 = arith.constant dense<0.000000e+00> : vector<1xf32>
    %70 = vector.multi_reduction <add>, %69, %cst_22 [1, 2] : vector<1x8x1xf32> to vector<1xf32>
    %71 = vector.shape_cast %70 : vector<1xf32> to vector<1x1x1xf32>
    %72 = vector.extract %71[0, 0, 0] : f32 from vector<1x1x1xf32>
    %cst_23 = arith.constant 2.500000e+01 : f32
    %73 = arith.mulf %72, %cst_23 : f32
    %cst_24 = arith.constant 0.000000e+00 : f32
    %74 = vector.broadcast %cst_24 : f32 to vector<8x1xf32>
    %75 = arith.maximumf %51, %74 : vector<8x1xf32>
    %76 = math.absf %51 : vector<8x1xf32>
    %cst_25 = arith.constant 0.000000e+00 : f32
    %77 = vector.broadcast %cst_25 : f32 to vector<8x1xf32>
    %78 = arith.subf %77, %76 : vector<8x1xf32>
    %79 = math.exp %78 : vector<8x1xf32>
    %cst_26 = arith.constant 1.000000e+00 : f32
    %80 = vector.broadcast %cst_26 : f32 to vector<8x1xf32>
    %81 = arith.addf %80, %79 : vector<8x1xf32>
    %82 = math.log %81 : vector<8x1xf32>
    %83 = arith.addf %75, %82 : vector<8x1xf32>
    %84 = arith.mulf %60, %51 : vector<8x1xf32>
    %85 = arith.subf %83, %84 : vector<8x1xf32>
    %86 = arith.mulf %85, %56 : vector<8x1xf32>
    %87 = vector.shape_cast %86 : vector<8x1xf32> to vector<1x8x1xf32>
    %cst_27 = arith.constant dense<0.000000e+00> : vector<1xf32>
    %88 = vector.multi_reduction <add>, %87, %cst_27 [1, 2] : vector<1x8x1xf32> to vector<1xf32>
    %89 = vector.shape_cast %88 : vector<1xf32> to vector<1x1x1xf32>
    %90 = vector.extract %89[0, 0, 0] : f32 from vector<1x1x1xf32>
    %cst_28 = arith.constant 4.000000e+00 : f32
    %91 = arith.divf %90, %cst_28 : f32
    %c0_29 = arith.constant 0 : index
    %92 = memref.load %arg8[%c0_29] : memref<2xf32, #tpu.memory_space<smem>>
    memref.store %91, %arg8[%c0_29] : memref<2xf32, #tpu.memory_space<smem>>
    %c1 = arith.constant 1 : index
    %93 = memref.load %arg8[%c1] : memref<2xf32, #tpu.memory_space<smem>>
    memref.store %73, %arg8[%c1] : memref<2xf32, #tpu.memory_space<smem>>
    return
  }
}

</mosaic_0001>

<bundles_post_ra>
// kernel: tpu_custom_call.1
= control target key start
LH: loop header
LB: loop body
LE: loop exit
PB: predicated region body
PF: predicated region fallthrough
CT: control target
= control target key end

     0   :  { %s769_s0 = inlined_call_operand.vmem [shape: f32[8,4], index: 0, kind: input, shape index: {}]   ;;  %s770_s1 = inlined_call_operand.vmem [shape: f32[8,32], index: 1, kind: input, shape index: {}]   ;;  %s771_s2 = inlined_call_operand.hbm [shape: f32[32,512], index: 2, kind: input, shape index: {}]   ;;  %s772_s3 = inlined_call_operand.vmem [shape: f32[1,128], index: 3, kind: input, shape index: {}]   ;;  %s773_s4 = inlined_call_operand.hbm [shape: f32[128,128], index: 4, kind: input, shape index: {}]   ;;  %s774_s5 = inlined_call_operand.vmem [shape: f32[1,128], index: 5, kind: input, shape index: {}]   ;;  %s775_s6 = inlined_call_operand.vmem [shape: f32[1,128], index: 6, kind: input, shape index: {}]   ;;  %s776_s7 = inlined_call_operand.<no memory space> [shape: f32[1,1], index: 7, kind: input, shape index: {}]   ;;  %s777_s8 = inlined_call_operand.hbm [shape: f32[2], index: 8, kind: output, shape index: {}]  }
   0x1   :  { %v13_v0 = vstv %s776_s7 }
   0x2   :  { %14 = vst [vmem:[#allocation2] sm:$0x1] %v13_v0 }
   0x3   :  { %15 = vsyncpa [#allocation4], 0 }
   0x4   :  { %16 = vsyncpa [#allocation7], 0 }
   0x5   :  { %17 = vsyncpa [#allocation5], 0  ;;  %s645_s29 = smov [#allocation3]   ;;  %s585_s11 = scalar_lea.hbm %s771_s2, 2048 }
   0x6   :  { %s27_s30 = sshll.u32 %s645_s29, 4  ;;  %p586_p0 = scmp.ne.s32.totalorder %s771_s2, %s585_s11  ;;  %s28_s30 = int_to_ptr.vmem [resolvable:$true] %s27_s30 }
   0x7   :  { %p589_p1 = scmp.lt.u32.totalorder %s585_s11, %s771_s2 }
   0x9   :  { %p591_p2 = pnand %p589_p1, %p586_p0 }
   0xb   :  { %594 = shalt.err (!%p591_p2)
}
   0xc   :  { %s595_s7 = scalar_lea.vmem %s28_s30, 2048  ;;  %p600_p4 = scmp.lt.s32.totalorder %s28_s30, %s28_s30 }
   0xd   :  { %p596_p3 = scmp.ne.s32.totalorder %s28_s30, %s595_s7  ;;  %p601_p5 = scmp.lt.s32.totalorder %s595_s7, %s595_s7 }
   0xf   :  { %p602_p6 = por %p601_p5, %p600_p4 }
  0x11   :  { %p603_p7 = pnand %p602_p6, %p596_p3 }
  0x13   :  { %606 = shalt.err (!%p603_p7)
}
  0x14   :  { %s646_s16 = smov 512   ;;  %s647_s17 = smov 32  }
  0x15   :  { %33 = dma.hbm_to_vmem [thread:$0]  %s771_s2, 2048, %s28_s30, [#allocation4], %s646_s16, %s646_s16, %s647_s17  }
  0x16   :  { %s648_s20 = smov [#allocation6]   ;;  %s607_s24 = scalar_lea.hbm %s773_s4, 2048 }
  0x17   :  { %s41_s21 = sshll.u32 %s648_s20, 4  ;;  %p608_p8 = scmp.ne.s32.totalorder %s773_s4, %s607_s24  ;;  %s42_s21 = int_to_ptr.vmem [resolvable:$true] %s41_s21 }
  0x18   :  { %p611_p9 = scmp.lt.u32.totalorder %s607_s24, %s773_s4 }
  0x1a   :  { %p613_p10 = pnand %p611_p9, %p608_p8 }
  0x1c   :  { %616 = shalt.err (!%p613_p10)
}
  0x1d   :  { %s617_s29 = scalar_lea.vmem %s42_s21, 2048  ;;  %p622_p12 = scmp.lt.s32.totalorder %s42_s21, %s42_s21 }
  0x1e   :  { %p618_p11 = scmp.ne.s32.totalorder %s42_s21, %s617_s29  ;;  %p623_p13 = scmp.lt.s32.totalorder %s617_s29, %s617_s29 }
  0x20   :  { %p624_p0 = por %p623_p13, %p622_p12 }
  0x22   :  { %p625_p1 = pnand %p624_p0, %p618_p11 }
  0x24   :  { %628 = shalt.err (!%p625_p1)
}
  0x25   :  { %s649_s2 = smov 128   ;;  %s650_s30 = smov 8  }
  0x26   :  { %47 = dma.hbm_to_vmem [thread:$0]  %s773_s4, 2048, %s42_s21, [#allocation7], %s649_s2, %s649_s2, %s650_s30  }
  0x27   :  { %639 = dma.done.wait [#allocation4], 2048  }
  0x28   :  { %640 = vsyncadd [#allocation4], 4294965248 }
  0x29   :  { %641 = dma.done.wait [#allocation7], 2048  }
  0x2a   :  { %642 = vsyncadd [#allocation7], 4294965248  ;;  %vm62_vm0 = vcmask 31744   ;;  %v60_v1 = vld [vmem:[%s769_s0] sm:$0xff]  ;;  %v75_v3 = vld [vmem:[#allocation3 + $0x8] sm:$0xff]  ;;  %v651_v10 = vmov 0.0  }
  0x2b   :  { %v63_v2 = vsel %vm62_vm0, %v60_v1, -inf  ;;  %v79_v4 = vld [vmem:[#allocation3 + $0x28] sm:$0xff]  ;;  %v74_v5 = vld [vmem:[#allocation3] sm:$0xff]  ;;  %158 = vmatprep.mubr.f32.mxu1 %v651_v10  ;;  %v77_v15 = vld [vmem:[#allocation3 + $0x18] sm:$0xff]  ;;  %vm90_vm1 = vcmask 261120   ;;  %v652_v34 = vmov 2  }
  0x2c   :  { %64 = vmax.xlane.f32.xlu0 %v63_v2  ;;  %v514_v6 = vpack.c.bf16 %v79_v4, %v75_v3  ;;  %v78_v7 = vld [vmem:[#allocation3 + $0x20] sm:$0xff]  ;;  %v83_v8 = vld [vmem:[#allocation3 + $0x48] sm:$0xff]  ;;  %v81_v16 = vld [vmem:[#allocation3 + $0x38] sm:$0xff]  ;;  %v653_v35 = vmov 0   ;;  %v654_v39 = vmov 0.0|0.0   ;;  %v655_v58 = vmov 1  }
  0x2d   :  { %v87_v9 = vld [vmem:[#allocation3 + $0x68] sm:$0xff]  ;;  %v516_v11 = vpack.c.bf16 %v78_v7, %v74_v5  ;;  %v82_v13 = vld [vmem:[#allocation3 + $0x40] sm:$0xff]  ;;  %v522_v18 = vpack.c.bf16 %v81_v16, %v77_v15  ;;  %v76_v19 = vld [vmem:[#allocation3 + $0x10] sm:$0xff]  ;;  %574 = vset.pattern.permute.xlu0 %v652_v34  ;;  %572 = vset.pattern.permute.xlu1 %v653_v35  ;;  %v656_v62 = vmov 3   ;;  %vm657_vm2 = vmmov 0   ;;  %s629_s20 = scalar_lea.hbm %s777_s8, 16 }
  0x2e   :  { %v518_v12 = vpack.c.bf16 %v87_v9, %v83_v8  ;;  %v86_v14 = vld [vmem:[#allocation3 + $0x60] sm:$0xff]  ;;  %515 = vmatprep.subr.bf16.mxu1 %v514_v6  ;;  %v80_v20 = vld [vmem:[#allocation3 + $0x30] sm:$0xff]  ;;  %v85_v21 = vld [vmem:[#allocation3 + $0x58] sm:$0xff]  ;;  %530 = vmatprep.subr.bf16.mxu0 %v654_v39  ;;  %vm396_vm7 = vcmask 7168   ;;  %p630_p2 = scmp.ne.s32.totalorder %s777_s8, %s629_s20  ;;  %p633_p3 = scmp.lt.u32.totalorder %s629_s20, %s777_s8 }
  0x2f   :  { %517 = vmatpush1.bf16.msra.mxu1 %v516_v11  ;;  %v520_v17 = vpack.c.bf16 %v86_v14, %v82_v13  ;;  %v89_v22 = vld [vmem:[#allocation3 + $0x78] sm:$0xff]  ;;  %v524_v24 = vpack.c.bf16 %v80_v20, %v76_v19  ;;  %v84_v26 = vld [vmem:[#allocation3 + $0x50] sm:$0xff]  ;;  %v269_v36 = vld [vmem:[#allocation6] sm:$0xff]  ;;  %511 = vmatprep.mubr.msk.f32.mxu0 %vm657_vm2, %v651_v10 }
  0x30   :  { %519 = vmatprep.subr.bf16.mxu1 %v518_v12  ;;  %v61_v23 = vld [vmem:[%s770_s1] sm:$0xff]  ;;  %v526_v25 = vpack.c.bf16 %v89_v22, %v85_v21  ;;  %v88_v27 = vld [vmem:[#allocation3 + $0x70] sm:$0xff]  ;;  %v270_v37 = vld [vmem:[#allocation6 + $0x8] sm:$0xff]  ;;  %p635_p4 = pnand %p633_p3, %p630_p2 }
  0x31   :  { %v528_v28 = vpack.c.bf16 %v88_v27, %v84_v26  ;;  %v271_v38 = vld [vmem:[#allocation6 + $0x10] sm:$0xff]  ;;  %v531_v40 = vpack.c.bf16 %v270_v37, %v269_v36  ;;  %v272_v41 = vld [vmem:[#allocation6 + $0x18] sm:$0xff]  ;;  %v273_v43 = vld [vmem:[#allocation6 + $0x20] sm:$0xff] }
  0x32   :  { %v534_v42 = vpack.c.bf16 %v272_v41, %v271_v38  ;;  %v274_v44 = vld [vmem:[#allocation6 + $0x28] sm:$0xff]  ;;  %v275_v46 = vld [vmem:[#allocation6 + $0x30] sm:$0xff]  ;;  %v276_v47 = vld [vmem:[#allocation6 + $0x38] sm:$0xff] }
  0x33   :  { %521 = vmatpush1.bf16.msra.mxu1 %v520_v17  ;;  %532 = vmatpush3.bf16.msra.mxu0 %v531_v40  ;;  %v537_v45 = vpack.c.bf16 %v274_v44, %v273_v43  ;;  %v540_v48 = vpack.c.bf16 %v276_v47, %v275_v46  ;;  %v277_v55 = vld [vmem:[#allocation6 + $0x40] sm:$0xff]  ;;  %v278_v56 = vld [vmem:[#allocation6 + $0x48] sm:$0xff]  ;;  %v279_v59 = vld [vmem:[#allocation6 + $0x50] sm:$0xff] }
  0x34   :  { %523 = vmatprep.subr.bf16.mxu1 %v522_v18  ;;  %533 = vmatprep.subr.bf16.mxu0 %v654_v39  ;;  %v543_v57 = vpack.c.bf16 %v278_v56, %v277_v55  ;;  %v280_v60 = vld [vmem:[#allocation6 + $0x58] sm:$0xff]  ;;  %v281_v0 = vld [vmem:[#allocation6 + $0x60] sm:$0xff]  ;;  %v283_v3 = vld [vmem:[#allocation6 + $0x70] sm:$0xff] }
  0x35   :  { %v546_v61 = vpack.c.bf16 %v280_v60, %v279_v59  ;;  %v284_v4 = vld [vmem:[#allocation6 + $0x78] sm:$0xff] }
  0x36   :  { %452 = vmatmul.mubr.msk.f32.vlgmr.msra.gmra.mrb[0].mxu1 %vm90_vm1, %v61_v23  ;;  %v552_v5 = vpack.c.bf16 %v284_v4, %v283_v3  ;;  %v454_v17 = vld [vmem:[%s772_s3] ss:$0 sm:$0xff] }
  0x37   :  { %525 = vmatpush1.bf16.msra.mxu1 %v524_v24  ;;  %229 = vmatprep.mubr.f32.mxu1 %v651_v10  ;;  %v455_v21 = vld [vmem:[%s774_s5] ss:$0 sm:$0xff] }
  0x38   :  { %527 = vmatprep.subr.bf16.mxu1 %v526_v25  ;;  %535 = vmatpush3.bf16.msra.mxu0 %v534_v42  ;;  %v456_v25 = vld [vmem:[%s775_s6] ss:$0 sm:$0xff] }
  0x39   :  { %536 = vmatprep.subr.bf16.mxu0 %v654_v39 }
  0x3b   :  { %529 = vmatpush1.bf16.msra.mxu1 %v528_v28  ;;  %v381_v28 = vlaneseq }
  0x3c   :  { %538 = vmatpush3.bf16.msra.mxu0 %v537_v45 }
  0x3d   :  { %539 = vmatprep.subr.bf16.mxu0 %v654_v39 }
  0x3e   :  { %453 = vmatmul.mubr.msk.f32.vlgmr.msra.gmra.mrb[2].mxu1 %vm90_vm1, %v61_v23 }
  0x40   :  { %541 = vmatpush3.bf16.msra.mxu0 %v540_v48 }
  0x41   :  { %542 = vmatprep.subr.bf16.mxu0 %v654_v39 }
  0x44   :  { %544 = vmatpush3.bf16.msra.mxu0 %v543_v57 }
  0x45   :  { %545 = vmatprep.subr.bf16.mxu0 %v654_v39 }
  0x48   :  { %547 = vmatpush3.bf16.msra.mxu0 %v546_v61 }
  0x49   :  { %548 = vmatprep.subr.bf16.mxu0 %v654_v39 }
  0xb9   :  { %v65_v29 = vpop.xlane.xlu0 %64 }
  0xba   :  { %v66_v30 = vsub.f32 %v60_v1, %v65_v29  ;;  %v282_v1 = vld [vmem:[#allocation6 + $0x68] sm:$0xff]  ;;  %v382_v29 = vshrl.u32 %v381_v28, 7 }
  0xbb   :  { %v549_v2 = vpack.c.bf16 %v282_v1, %v281_v0 }
  0xbc   :  { %v67_v31 = vmul.f32 1.442695, %v66_v30  ;;  %v457_v30 = vld [vmem:[#allocation2] ss:$0 sm:$0xff]  ;;  %vm383_vm3 = vcmp.lt.s32.totalorder %v382_v29, 4  ;;  %vm386_vm4 = vcmp.lt.s32.totalorder %v382_v29, 2 }
  0xbd   :  { %550 = vmatpush3.bf16.msra.mxu0 %v549_v2  ;;  %v458_v34 = vsel %vm383_vm3, 1.0, %v651_v10  ;;  %v459_v35 = vsel %vm386_vm4, 1.0, %v651_v10 }
  0xbe   :  { %577 = vpow2.f32 %v67_v31  ;;  %551 = vmatprep.subr.bf16.mxu0 %v654_v39 }
  0xc1   :  { %553 = vmatpush3.bf16.msra.mxu0 %v552_v5 }
  0xc8   :  { %v578_v32 = vpop.eup %577 }
  0xc9   :  { %v69_v33 = vsel %vm62_vm0, %v578_v32, 0.0 }
  0xca   :  { %70 = vadd.xlane.f32.xlu0 %v69_v33 }
 0x109   :  { %v160_v49 = vpop.f32.mrb[0].mxu1 }
 0x10a   :  { %v162_v50 = vpop.f32.mrb[1].mxu1 }
 0x111   :  { %v231_v51 = vpop.f32.mrb[2].mxu1 }
 0x112   :  { %v233_v63 = vpop.f32.mrb[3].mxu1 }
 0x157   :  { %v71_v52 = vpop.xlane.xlu0 %70 }
 0x158   :  { %579 = vrcp.f32 %v71_v52 }
 0x162   :  { %v580_v53 = vpop.eup %579 }
 0x163   :  { %v73_v54 = vmul.f32 %v580_v53, %v578_v32 }
 0x165   :  { %249 = vperm.xlu0 %574, %v73_v54   ;;  %238 = vperm.xlu1 %572, %v73_v54  }
 0x169   :  { %573 = vset.pattern.permute.xlu1 %v655_v58  ;;  %576 = vset.pattern.permute.xlu0 %v656_v62 }
 0x16a   :  { %243 = vperm.xlu1 %573, %v73_v54  }
 0x16e   :  { %575 = vset.pattern.permute.xlu1 %v656_v62 }
 0x16f   :  { %255 = vperm.xlu1 %575, %v73_v54  }
 0x1e4   :  { %v239_v6 = vpop.permute.xlu1 %238  ;;  %v250_v7 = vpop.permute.xlu0 %249 }
 0x1e5   :  { %v241_v9 = vmul.f32 %v239_v6, %v160_v49  ;;  %v252_v12 = vmul.f32 %v250_v7, %v231_v51 }
 0x1e9   :  { %v244_v8 = vpop.permute.xlu1 %243 }
 0x1ea   :  { %v246_v11 = vmul.f32 %v244_v8, %v162_v50 }
 0x1ec   :  { %v247_v13 = vadd.f32 %v246_v11, %v241_v9 }
 0x1ee   :  { %v253_v14 = vadd.f32 %v252_v12, %v247_v13  ;;  %v256_v15 = vpop.permute.xlu1 %255 }
 0x1ef   :  { %v258_v16 = vmul.f32 %v256_v15, %v233_v63 }
 0x1f1   :  { %v259_v18 = vadd.f32 %v258_v16, %v253_v14 }
 0x1f3   :  { %v267_v19 = vadd.f32 %v454_v17, %v259_v18 }
 0x1f5   :  { %v268_v20 = vmax.f32 %v267_v19, 0.0 }
 0x1f7   :  { %512 = vmatmul.mubr.f32.vlgmr.msra.gmra.mrb[0].mxu0 %v268_v20 }
 0x2ca   :  { %v358_v22 = vpop.f32.mrb[0].mxu0 }
 0x2cb   :  { %v359_v23 = vadd.f32 %v455_v21, %v358_v22  ;;  %v513_v24 = vpop.f32.mrb[1].mxu0 }
 0x2cd   :  { %v362_v26 = vmax.f32 %v359_v23, 0.0 }
 0x2cf   :  { %v370_v27 = vmul.f32 %v456_v25, %v362_v26 }
 0x2d1   :  { %371 = vadd.xlane.f32.xlu1 %v370_v27 }
 0x35e   :  { %v372_v31 = vpop.xlane.xlu1 %371 }
 0x35f   :  { %v380_v32 = vadd.f32 %v457_v30, %v372_v31 }
 0x361   :  { %v409_v33 = vand.u32 2147483647, %v380_v32  ;;  %vm389_vm5 = vcmp.ge.f32.partialorder %v380_v32, 0.0  ;;  %v408_v45 = vmax.f32 %v380_v32, 0.0  ;;  %v417_v48 = vmul.f32 %v459_v35, %v380_v32 }
 0x362   :  { %v460_v36 = vsel %vm389_vm5, 1.0, %v651_v10 }
 0x363   :  { %v410_v37 = vsub.f32 0.0, %v409_v33  ;;  %vm392_vm6 = vcmp.eq.f32.partialorder %v460_v36, %v459_v35 }
 0x364   :  { %v461_v38 = vsel %vm392_vm6, 1.0, %v651_v10 }
 0x365   :  { %v411_v39 = vmul.f32 1.442695, %v410_v37  ;;  %v395_v40 = vmul.f32 %v461_v38, %v458_v34 }
 0x367   :  { %581 = vpow2.f32 %v411_v39  ;;  %v397_v41 = vsel %vm396_vm7, %v395_v40, 0.0 }
 0x368   :  { %398 = vadd.xlane.f32.xlu1 %v397_v41 }
 0x371   :  { %v582_v42 = vpop.eup %581 }
 0x372   :  { %v413_v43 = vadd.f32 1.0, %v582_v42 }
 0x374   :  { %583 = vlog2.f32 %v413_v43 }
 0x37e   :  { %v584_v44 = vpop.eup %583 }
 0x37f   :  { %v415_v46 = vmul.f32 0.6931472, %v584_v44 }
 0x381   :  { %v416_v47 = vadd.f32 %v415_v46, %v408_v45 }
 0x383   :  { %v418_v49 = vsub.f32 %v416_v47, %v417_v48 }
 0x385   :  { %v419_v50 = vmul.f32 %v458_v34, %v418_v49 }
 0x387   :  { %v420_v51 = vsel %vm396_vm7, %v419_v50, 0.0 }
 0x388   :  { %421 = vadd.xlane.f32.xlu0 %v420_v51 }
 0x3f5   :  { %v399_v10 = vpop.xlane.xlu1 %398 }
 0x3f6   :  { %v400_v52 = vrot.slane %v399_v10, 4 }
 0x3f8   :  { %v401_v53 = vadd.f32 %v400_v52, %v399_v10 }
 0x3fa   :  { %v402_v54 = vrot.slane %v401_v53, 2 }
 0x3fc   :  { %v403_v55 = vadd.f32 %v402_v54, %v401_v53 }
 0x3fe   :  { %v404_v56 = vrot.slane %v403_v55, 1 }
 0x400   :  { %v405_v57 = vadd.f32 %v404_v56, %v403_v55 }
 0x402   :  { %554 = vpush %v405_v57 }
 0x415   :  { %v422_v58 = vpop.xlane.xlu0 %421 }
 0x416   :  { %v423_v59 = vrot.slane %v422_v58, 4 }
 0x418   :  { %v424_v60 = vadd.f32 %v423_v59, %v422_v58 }
 0x41a   :  { %v425_v61 = vrot.slane %v424_v60, 2 }
 0x41c   :  { %v426_v62 = vadd.f32 %v425_v61, %v424_v60 }
 0x41e   :  { %v427_v63 = vrot.slane %v426_v62, 1 }
 0x420   :  { %v428_v0 = vadd.f32 %v427_v63, %v426_v62 }
 0x422   :  { %556 = vpush %v428_v0 }
 0x433   :  { %s555_s3 = spop %554 }
 0x434   :  { %s407_s5 = smul.f32 25.0, %s555_s3 }
 0x436   :  { %436 = sst [smem:[#allocation8 + $0x1]] %s407_s5 }
 0x453   :  { %s557_s6 = spop %556 }
 0x454   :  { %s432_s17 = smul.f32 0.25, %s557_s6 }
 0x456   :  { %434 = sst [smem:[#allocation8]] %s432_s17 }
 0x457   :  { %638 = shalt.err (!%p635_p4)
}
 0x458   :  { %s658_s25 = smov [#allocation8]  }
 0x459   :  { %444 = dma.smem_to_hbm %s658_s25, 16, %s777_s8, [#allocation5]  }
 0x45a   :  { %643 = dma.done.wait [#allocation5], 16  }
 0x45b   :  { %644 = vsyncadd [#allocation5], 4294967280 }
 0x45c   :  { %448 = sfence }
 0x45d   :  { %449 = vsyncpa [#allocation4], 1 }
 0x45e   :  { %450 = vsyncpa [#allocation7], 1 }
 0x45f   :  { %451 = vsyncpa [#allocation5], 1 }

</bundles_post_ra>
